<compile_context>
chip_gen: v5e
topology: v5e:2x2
jax: 0.10.0
libtpu: 0.0.40
codegen_flags: <defaults>
</compile_context>

<pallas_src>
import functools
import math

import jax
import jax.numpy as jnp
from jax.experimental import pallas as pl
from jax.experimental.pallas import tpu as pltpu


def _mhma_kernel(x_ref, g_ref, pos0_ref, posg_ref,
                 wq_ref, bq_ref, wk_ref, bk_ref, wv_ref, bv_ref,
                 wo_ref, bo_ref, gamma_ref, beta_ref, o_ref,
                 *, h, d_k, d_v):
    """One (TB, HW, C) batch block: token prep + attention pool + residual + LN."""
    tb, hw, c = x_ref.shape
    hdk = h * d_k
    hdv = h * d_v
    scale = 1.0 / math.sqrt(d_k)

    x_hw = x_ref[...]                                    # (TB, HW, C) raw grid features
    g_hw = g_ref[...]                                    # (TB, HW, 1) loss-map logits
    pos0 = pos0_ref[...]                                 # (1, C)      pos-emb of mean token
    posg = posg_ref[...]                                 # (HW, C)     pos-emb of grid tokens

    # ---- fused token prep: mean token + positional embedding ----------------
    x_mean = jnp.mean(x_hw, axis=1)                      # (TB, C)
    q_in = x_mean + pos0                                 # (TB, C)  query / residual token
    xg = (x_hw + posg[None, :, :]).reshape(tb * hw, c)   # (TB*HW, C) grid tokens (pos added)
    g0 = jnp.mean(g_hw, axis=1)                          # (TB, 1)  loss-bias of mean token

    # ---- Q/K/V projections (batched MXU matmuls) -----------------------------
    q = jnp.dot(q_in, wq_ref[...], preferred_element_type=jnp.float32) + bq_ref[...]    # (TB, hdk)
    k0 = jnp.dot(q_in, wk_ref[...], preferred_element_type=jnp.float32) + bk_ref[...]   # (TB, hdk)
    v0 = jnp.dot(q_in, wv_ref[...], preferred_element_type=jnp.float32) + bv_ref[...]   # (TB, hdv)
    kg = jnp.dot(xg, wk_ref[...], preferred_element_type=jnp.float32) + bk_ref[...]     # (TB*HW, hdk)
    vg = jnp.dot(xg, wv_ref[...], preferred_element_type=jnp.float32) + bv_ref[...]     # (TB*HW, hdv)

    # ---- all-head scores via a constant head-block reduction matrix ---------
    # red_k[col, head] = 1  iff  col in [head*d_k, (head+1)*d_k)
    rk_r = jax.lax.broadcasted_iota(jnp.int32, (hdk, h), 0)
    rk_c = jax.lax.broadcasted_iota(jnp.int32, (hdk, h), 1)
    red_k = ((rk_r >= rk_c * d_k) & (rk_r < (rk_c + 1) * d_k)).astype(jnp.float32)

    s0 = jnp.dot(q * k0, red_k, preferred_element_type=jnp.float32) * scale + g0        # (TB, h)
    qkg = kg.reshape(tb, hw, hdk) * q[:, None, :]                                        # (TB, HW, hdk)
    sg = jnp.dot(qkg.reshape(tb * hw, hdk), red_k,
                 preferred_element_type=jnp.float32).reshape(tb, hw, h) * scale + g_hw   # (TB, HW, h)

    # ---- softmax over the N = HW + 1 tokens (mean token handled as chunk 0) -
    m = jnp.maximum(jnp.max(sg, axis=1), s0)             # (TB, h)
    p0 = jnp.exp(s0 - m)                                 # (TB, h)
    pg = jnp.exp(sg - m[:, None, :])                     # (TB, HW, h)
    denom = p0 + jnp.sum(pg, axis=1)                     # (TB, h)
    inv = pl.reciprocal(denom, approx=True)              # (TB, h)  EUP reciprocal
    # TODO(synk): attention dropout is identity (eval mode).

    # ---- weighted value sum via a constant head-expansion matrix ------------
    # expand_v[head, col] = 1  iff  col in [head*d_v, (head+1)*d_v)
    ev_r = jax.lax.broadcasted_iota(jnp.int32, (h, hdv), 0)
    ev_c = jax.lax.broadcasted_iota(jnp.int32, (h, hdv), 1)
    expand_v = ((ev_c >= ev_r * d_v) & (ev_c < (ev_r + 1) * d_v)).astype(jnp.float32)

    w0 = jnp.dot(p0, expand_v, preferred_element_type=jnp.float32) * v0                 # (TB, hdv)
    wg = jnp.dot(pg.reshape(tb * hw, h), expand_v,
                 preferred_element_type=jnp.float32) * vg                                # (TB*HW, hdv)
    ctx = w0 + jnp.sum(wg.reshape(tb, hw, hdv), axis=1)                                  # (TB, hdv)
    ctx = ctx * jnp.dot(inv, expand_v, preferred_element_type=jnp.float32)               # per-head normalize

    # ---- output projection + residual + LayerNorm ---------------------------
    att_out = jnp.dot(ctx, wo_ref[...], preferred_element_type=jnp.float32) + bo_ref[...]  # (TB, d_out)
    # TODO(synk): output dropout is identity (eval mode).
    res = q_in + att_out
    mu = jnp.mean(res, axis=-1, keepdims=True)
    var = jnp.mean((res - mu) ** 2, axis=-1, keepdims=True)
    ln = (res - mu) * jax.lax.rsqrt(var + 1e-5) * gamma_ref[...] + beta_ref[...]

    o_ref[0] = ln


def _pick_tb(b, max_tb=16):
    """Largest divisor of b <= max_tb that leaves >= 2 grid steps (when b >= 2)."""
    best = 1
    for tb in range(1, min(b, max_tb) + 1):
        if b % tb == 0 and (b == 1 or b // tb >= 2):
            best = tb
    return best


def multi_head_map_attention(feature_map, loss_map, params, *, h, d_k, d_v):
    """feature_map: (B, C, H, W) NCHW; loss_map: (B, 1, H, W). Returns squeezed (B, d_out)."""
    b, c, hh, ww = feature_map.shape
    hw = hh * ww
    d_out = params["wo"].shape[1]

    # NCHW -> token-major (B, HW, C). This transpose is the only XLA-side prep;
    # mean token / pos-emb / loss-map bias are all built inside the kernel.
    # TODO(synk): a channels-first kernel could fuse this transpose as well.
    x_hw = feature_map.reshape(b, c, hw).transpose(0, 2, 1)       # (B, HW, C)
    lm = loss_map.reshape(b, hw, 1)                               # (B, HW, 1)

    pos0 = params["pos_emb"][0:1, :]                              # (1, C)
    posg = params["pos_emb"][1:, :]                               # (HW, C)

    tb = _pick_tb(b)
    steps = b // tb

    kernel = functools.partial(_mhma_kernel, h=h, d_k=d_k, d_v=d_v)

    def resident(a):
        nd = a.ndim

        def idx(i):
            return (0,) * nd

        return pl.BlockSpec(a.shape, idx)

    out = pl.pallas_call(
        kernel,
        out_shape=jax.ShapeDtypeStruct((steps, tb, d_out), jnp.float32),
        grid_spec=pltpu.PrefetchScalarGridSpec(
            num_scalar_prefetch=0,
            grid=(steps,),
            in_specs=[
                pl.BlockSpec((tb, hw, c), lambda i: (i, 0, 0)),    # feature block
                pl.BlockSpec((tb, hw, 1), lambda i: (i, 0, 0)),    # loss-map block
                resident(pos0), resident(posg),
                resident(params["wq"]), resident(params["bq"]),
                resident(params["wk"]), resident(params["bk"]),
                resident(params["wv"]), resident(params["bv"]),
                resident(params["wo"]), resident(params["bo"]),
                resident(params["gamma"]), resident(params["beta"]),
            ],
            out_specs=pl.BlockSpec((1, tb, d_out), lambda i: (i, 0, 0)),
        ),
        compiler_params=pltpu.CompilerParams(dimension_semantics=("parallel",)),
    )(x_hw, lm, pos0, posg,
      params["wq"], params["bq"], params["wk"], params["bk"],
      params["wv"], params["bv"], params["wo"], params["bo"],
      params["gamma"], params["beta"])

    out = out.reshape(b, d_out)
    # Matches the PyTorch `.squeeze()` (drops the batch dim iff B == 1).
    return jnp.squeeze(out)


def _xavier_uniform(key, fan_in, fan_out):
    limit = math.sqrt(6.0 / (fan_in + fan_out))
    return jax.random.uniform(key, (fan_in, fan_out), jnp.float32, -limit, limit)


def init_params(key, *, d_in, d_out, d_k, d_v, h, spacial_dim):
    ks = jax.random.split(key, 5)
    n = spacial_dim ** 2 + 1
    return {
        "wq": _xavier_uniform(ks[0], d_in, h * d_k),
        "bq": jnp.zeros((1, h * d_k), jnp.float32),
        "wk": _xavier_uniform(ks[1], d_in, h * d_k),
        "bk": jnp.zeros((1, h * d_k), jnp.float32),
        "wv": _xavier_uniform(ks[2], d_in, h * d_v),
        "bv": jnp.zeros((1, h * d_v), jnp.float32),
        "wo": _xavier_uniform(ks[3], h * d_v, d_out),
        "bo": jnp.zeros((1, d_out), jnp.float32),
        "gamma": jnp.ones((1, d_out), jnp.float32),
        "beta": jnp.zeros((1, d_out), jnp.float32),
        "pos_emb": jax.random.normal(ks[4], (n, d_in), jnp.float32) / math.sqrt(d_in),
    }


if __name__ == "__main__":
    # Small, module-consistent shapes: d_in = d_out = 32, d_k = d_v = 8, h = 4,
    # spacial_dim = 4 (feature_map (B, 32, 4, 4), loss_map (B, 1, 4, 4)).
    B, C, S = 2, 32, 4
    d_k = d_v = 8
    n_heads = 4

    key = jax.random.PRNGKey(0)
    k_fm, k_lm, k_p = jax.random.split(key, 3)
    feature_map = jax.random.normal(k_fm, (B, C, S, S), jnp.float32)
    loss_map = jax.random.normal(k_lm, (B, 1, S, S), jnp.float32)

    params = init_params(k_p, d_in=C, d_out=C, d_k=d_k, d_v=d_v,
                         h=n_heads, spacial_dim=S)

    out = multi_head_map_attention(feature_map, loss_map, params,
                                   h=n_heads, d_k=d_k, d_v=d_v)
    out = jax.block_until_ready(out)
    assert out.shape == (B, C)
    assert bool(jnp.all(jnp.isfinite(out)))
    print("KERNEL_OK")
</pallas_src>

<mosaic_0001>
module attributes {stable_mosaic.version = 11 : i64} {
  func.func @_mhma_kernel(%arg0: i32, %arg1: memref<1x16x32xf32, #tpu.memory_space<vmem>>, %arg2: memref<1x16x1xf32, #tpu.memory_space<vmem>>, %arg3: memref<1x32xf32, #tpu.memory_space<vmem>>, %arg4: memref<16x32xf32, #tpu.memory_space<vmem>>, %arg5: memref<32x32xf32, #tpu.memory_space<vmem>>, %arg6: memref<1x32xf32, #tpu.memory_space<vmem>>, %arg7: memref<32x32xf32, #tpu.memory_space<vmem>>, %arg8: memref<1x32xf32, #tpu.memory_space<vmem>>, %arg9: memref<32x32xf32, #tpu.memory_space<vmem>>, %arg10: memref<1x32xf32, #tpu.memory_space<vmem>>, %arg11: memref<32x32xf32, #tpu.memory_space<vmem>>, %arg12: memref<1x32xf32, #tpu.memory_space<vmem>>, %arg13: memref<1x32xf32, #tpu.memory_space<vmem>>, %arg14: memref<1x32xf32, #tpu.memory_space<vmem>>, %arg15: memref<1x1x32xf32, #tpu.memory_space<vmem>>) attributes {dimension_semantics = [#tpu.dimension_semantics<parallel>], iteration_bounds = array<i64: 2>, scalar_prefetch = 0 : i64, scratch_operands = 0 : i64, tpu.core_type = #tpu.core_type<tc>, window_params = [{transform_indices = @transform_0, window_bounds = array<i64: 1, 16, 32>}, {transform_indices = @transform_1, window_bounds = array<i64: 1, 16, 1>}, {pipeline_mode = #tpu.pipeline_mode<synchronous>, transform_indices = @transform_2, window_bounds = array<i64: 1, 32>}, {pipeline_mode = #tpu.pipeline_mode<synchronous>, transform_indices = @transform_3, window_bounds = array<i64: 16, 32>}, {pipeline_mode = #tpu.pipeline_mode<synchronous>, transform_indices = @transform_4, window_bounds = array<i64: 32, 32>}, {pipeline_mode = #tpu.pipeline_mode<synchronous>, transform_indices = @transform_5, window_bounds = array<i64: 1, 32>}, {pipeline_mode = #tpu.pipeline_mode<synchronous>, transform_indices = @transform_6, window_bounds = array<i64: 32, 32>}, {pipeline_mode = #tpu.pipeline_mode<synchronous>, transform_indices = @transform_7, window_bounds = array<i64: 1, 32>}, {pipeline_mode = #tpu.pipeline_mode<synchronous>, transform_indices = @transform_8, window_bounds = array<i64: 32, 32>}, {pipeline_mode = #tpu.pipeline_mode<synchronous>, transform_indices = @transform_9, window_bounds = array<i64: 1, 32>}, {pipeline_mode = #tpu.pipeline_mode<synchronous>, transform_indices = @transform_10, window_bounds = array<i64: 32, 32>}, {pipeline_mode = #tpu.pipeline_mode<synchronous>, transform_indices = @transform_11, window_bounds = array<i64: 1, 32>}, {pipeline_mode = #tpu.pipeline_mode<synchronous>, transform_indices = @transform_12, window_bounds = array<i64: 1, 32>}, {pipeline_mode = #tpu.pipeline_mode<synchronous>, transform_indices = @transform_13, window_bounds = array<i64: 1, 32>}, {transform_indices = @transform_14, window_bounds = array<i64: 1, 1, 32>}]} {
    %c0 = arith.constant 0 : index
    %c0_0 = arith.constant 0 : index
    %c0_1 = arith.constant 0 : index
    %0 = vector.load %arg1[%c0, %c0_0, %c0_1] : memref<1x16x32xf32, #tpu.memory_space<vmem>>, vector<1x16x32xf32>
    %c0_2 = arith.constant 0 : index
    %c0_3 = arith.constant 0 : index
    %c0_4 = arith.constant 0 : index
    %1 = vector.load %arg2[%c0_2, %c0_3, %c0_4] : memref<1x16x1xf32, #tpu.memory_space<vmem>>, vector<1x16x1xf32>
    %c0_5 = arith.constant 0 : index
    %c0_6 = arith.constant 0 : index
    %2 = vector.load %arg3[%c0_5, %c0_6] : memref<1x32xf32, #tpu.memory_space<vmem>>, vector<1x32xf32>
    %c0_7 = arith.constant 0 : index
    %c0_8 = arith.constant 0 : index
    %3 = vector.load %arg4[%c0_7, %c0_8] : memref<16x32xf32, #tpu.memory_space<vmem>>, vector<16x32xf32>
    %cst = arith.constant dense<0.000000e+00> : vector<1x32xf32>
    %4 = vector.multi_reduction <add>, %0, %cst [1] : vector<1x16x32xf32> to vector<1x32xf32>
    %cst_9 = arith.constant 1.600000e+01 : f32
    %5 = vector.broadcast %cst_9 : f32 to vector<1x32xf32>
    %6 = arith.divf %4, %5 : vector<1x32xf32>
    %7 = arith.addf %6, %2 : vector<1x32xf32>
    %8 = vector.shape_cast %3 : vector<16x32xf32> to vector<1x16x32xf32>
    %9 = arith.addf %0, %8 : vector<1x16x32xf32>
    %10 = vector.shape_cast %9 : vector<1x16x32xf32> to vector<16x32xf32>
    %cst_10 = arith.constant dense<0.000000e+00> : vector<1x1xf32>
    %11 = vector.multi_reduction <add>, %1, %cst_10 [1] : vector<1x16x1xf32> to vector<1x1xf32>
    %cst_11 = arith.constant 1.600000e+01 : f32
    %12 = vector.broadcast %cst_11 : f32 to vector<1x1xf32>
    %13 = arith.divf %11, %12 : vector<1x1xf32>
    %c0_12 = arith.constant 0 : index
    %c0_13 = arith.constant 0 : index
    %14 = vector.load %arg5[%c0_12, %c0_13] : memref<32x32xf32, #tpu.memory_space<vmem>>, vector<32x32xf32>
    %cst_14 = arith.constant dense<0.000000e+00> : vector<1x32xf32>
    %15 = tpu.matmul %7, %14, %cst_14 {dimension_numbers = #tpu.dot_dimension_numbers<[1], [0], [0], [1], [0, 0, 1, 1], [], []>} : vector<1x32xf32>, vector<32x32xf32>, vector<1x32xf32> -> vector<1x32xf32>
    %c0_15 = arith.constant 0 : index
    %c0_16 = arith.constant 0 : index
    %16 = vector.load %arg6[%c0_15, %c0_16] : memref<1x32xf32, #tpu.memory_space<vmem>>, vector<1x32xf32>
    %17 = arith.addf %15, %16 : vector<1x32xf32>
    %c0_17 = arith.constant 0 : index
    %c0_18 = arith.constant 0 : index
    %18 = vector.load %arg7[%c0_17, %c0_18] : memref<32x32xf32, #tpu.memory_space<vmem>>, vector<32x32xf32>
    %cst_19 = arith.constant dense<0.000000e+00> : vector<1x32xf32>
    %19 = tpu.matmul %7, %18, %cst_19 {dimension_numbers = #tpu.dot_dimension_numbers<[1], [0], [0], [1], [0, 0, 1, 1], [], []>} : vector<1x32xf32>, vector<32x32xf32>, vector<1x32xf32> -> vector<1x32xf32>
    %c0_20 = arith.constant 0 : index
    %c0_21 = arith.constant 0 : index
    %20 = vector.load %arg8[%c0_20, %c0_21] : memref<1x32xf32, #tpu.memory_space<vmem>>, vector<1x32xf32>
    %21 = arith.addf %19, %20 : vector<1x32xf32>
    %c0_22 = arith.constant 0 : index
    %c0_23 = arith.constant 0 : index
    %22 = vector.load %arg9[%c0_22, %c0_23] : memref<32x32xf32, #tpu.memory_space<vmem>>, vector<32x32xf32>
    %cst_24 = arith.constant dense<0.000000e+00> : vector<1x32xf32>
    %23 = tpu.matmul %7, %22, %cst_24 {dimension_numbers = #tpu.dot_dimension_numbers<[1], [0], [0], [1], [0, 0, 1, 1], [], []>} : vector<1x32xf32>, vector<32x32xf32>, vector<1x32xf32> -> vector<1x32xf32>
    %c0_25 = arith.constant 0 : index
    %c0_26 = arith.constant 0 : index
    %24 = vector.load %arg10[%c0_25, %c0_26] : memref<1x32xf32, #tpu.memory_space<vmem>>, vector<1x32xf32>
    %25 = arith.addf %23, %24 : vector<1x32xf32>
    %c0_27 = arith.constant 0 : index
    %c0_28 = arith.constant 0 : index
    %26 = vector.load %arg7[%c0_27, %c0_28] : memref<32x32xf32, #tpu.memory_space<vmem>>, vector<32x32xf32>
    %cst_29 = arith.constant dense<0.000000e+00> : vector<16x32xf32>
    %27 = tpu.matmul %10, %26, %cst_29 {dimension_numbers = #tpu.dot_dimension_numbers<[1], [0], [0], [1], [0, 0, 1, 1], [], []>} : vector<16x32xf32>, vector<32x32xf32>, vector<16x32xf32> -> vector<16x32xf32>
    %c0_30 = arith.constant 0 : index
    %c0_31 = arith.constant 0 : index
    %28 = vector.load %arg8[%c0_30, %c0_31] : memref<1x32xf32, #tpu.memory_space<vmem>>, vector<1x32xf32>
    %29 = vector.broadcast %28 : vector<1x32xf32> to vector<16x32xf32>
    %30 = arith.addf %27, %29 : vector<16x32xf32>
    %c0_32 = arith.constant 0 : index
    %c0_33 = arith.constant 0 : index
    %31 = vector.load %arg9[%c0_32, %c0_33] : memref<32x32xf32, #tpu.memory_space<vmem>>, vector<32x32xf32>
    %cst_34 = arith.constant dense<0.000000e+00> : vector<16x32xf32>
    %32 = tpu.matmul %10, %31, %cst_34 {dimension_numbers = #tpu.dot_dimension_numbers<[1], [0], [0], [1], [0, 0, 1, 1], [], []>} : vector<16x32xf32>, vector<32x32xf32>, vector<16x32xf32> -> vector<16x32xf32>
    %c0_35 = arith.constant 0 : index
    %c0_36 = arith.constant 0 : index
    %33 = vector.load %arg10[%c0_35, %c0_36] : memref<1x32xf32, #tpu.memory_space<vmem>>, vector<1x32xf32>
    %34 = vector.broadcast %33 : vector<1x32xf32> to vector<16x32xf32>
    %35 = arith.addf %32, %34 : vector<16x32xf32>
    %36 = tpu.iota {dimensions = array<i32: 0>} : vector<32x4xi32>
    %37 = tpu.iota {dimensions = array<i32: 1>} : vector<32x4xi32>
    %c8_i32 = arith.constant 8 : i32
    %38 = vector.broadcast %c8_i32 : i32 to vector<32x4xi32>
    %39 = arith.muli %37, %38 : vector<32x4xi32>
    %40 = arith.cmpi sge, %36, %39 : vector<32x4xi32>
    %c1_i32 = arith.constant 1 : i32
    %41 = vector.broadcast %c1_i32 : i32 to vector<32x4xi32>
    %42 = arith.addi %37, %41 : vector<32x4xi32>
    %c8_i32_37 = arith.constant 8 : i32
    %43 = vector.broadcast %c8_i32_37 : i32 to vector<32x4xi32>
    %44 = arith.muli %42, %43 : vector<32x4xi32>
    %45 = arith.cmpi slt, %36, %44 : vector<32x4xi32>
    %46 = arith.andi %40, %45 : vector<32x4xi1>
    %47 = arith.extui %46 : vector<32x4xi1> to vector<32x4xi32>
    %48 = arith.sitofp %47 : vector<32x4xi32> to vector<32x4xf32>
    %49 = arith.mulf %17, %21 : vector<1x32xf32>
    %cst_38 = arith.constant dense<0.000000e+00> : vector<1x4xf32>
    %50 = tpu.matmul %49, %48, %cst_38 {dimension_numbers = #tpu.dot_dimension_numbers<[1], [0], [0], [1], [0, 0, 1, 1], [], []>} : vector<1x32xf32>, vector<32x4xf32>, vector<1x4xf32> -> vector<1x4xf32>
    %cst_39 = arith.constant 0.353553385 : f32
    %51 = vector.broadcast %cst_39 : f32 to vector<1x4xf32>
    %52 = arith.mulf %50, %51 : vector<1x4xf32>
    %53 = vector.broadcast %13 : vector<1x1xf32> to vector<1x4xf32>
    %54 = arith.addf %52, %53 : vector<1x4xf32>
    %55 = vector.shape_cast %30 : vector<16x32xf32> to vector<1x16x32xf32>
    %56 = vector.shape_cast %17 : vector<1x32xf32> to vector<1x1x32xf32>
    %57 = vector.broadcast %56 : vector<1x1x32xf32> to vector<1x16x32xf32>
    %58 = arith.mulf %55, %57 : vector<1x16x32xf32>
    %59 = vector.shape_cast %58 : vector<1x16x32xf32> to vector<16x32xf32>
    %cst_40 = arith.constant dense<0.000000e+00> : vector<16x4xf32>
    %60 = tpu.matmul %59, %48, %cst_40 {dimension_numbers = #tpu.dot_dimension_numbers<[1], [0], [0], [1], [0, 0, 1, 1], [], []>} : vector<16x32xf32>, vector<32x4xf32>, vector<16x4xf32> -> vector<16x4xf32>
    %61 = vector.shape_cast %60 : vector<16x4xf32> to vector<1x16x4xf32>
    %cst_41 = arith.constant 0.353553385 : f32
    %62 = vector.broadcast %cst_41 : f32 to vector<1x16x4xf32>
    %63 = arith.mulf %61, %62 : vector<1x16x4xf32>
    %64 = vector.broadcast %1 : vector<1x16x1xf32> to vector<1x16x4xf32>
    %65 = arith.addf %63, %64 : vector<1x16x4xf32>
    %cst_42 = arith.constant dense<0xFF800000> : vector<1x4xf32>
    %66 = vector.multi_reduction <maximumf>, %65, %cst_42 [1] : vector<1x16x4xf32> to vector<1x4xf32>
    %67 = arith.maximumf %66, %54 : vector<1x4xf32>
    %68 = arith.subf %54, %67 : vector<1x4xf32>
    %69 = math.exp %68 : vector<1x4xf32>
    %70 = vector.shape_cast %67 : vector<1x4xf32> to vector<1x1x4xf32>
    %71 = vector.broadcast %70 : vector<1x1x4xf32> to vector<1x16x4xf32>
    %72 = arith.subf %65, %71 : vector<1x16x4xf32>
    %73 = math.exp %72 : vector<1x16x4xf32>
    %cst_43 = arith.constant dense<0.000000e+00> : vector<1x4xf32>
    %74 = vector.multi_reduction <add>, %73, %cst_43 [1] : vector<1x16x4xf32> to vector<1x4xf32>
    %75 = arith.addf %69, %74 : vector<1x4xf32>
    %76 = tpu.reciprocal %75 {approx = true} : vector<1x4xf32> -> vector<1x4xf32>
    %77 = tpu.iota {dimensions = array<i32: 0>} : vector<4x32xi32>
    %78 = tpu.iota {dimensions = array<i32: 1>} : vector<4x32xi32>
    %c8_i32_44 = arith.constant 8 : i32
    %79 = vector.broadcast %c8_i32_44 : i32 to vector<4x32xi32>
    %80 = arith.muli %77, %79 : vector<4x32xi32>
    %81 = arith.cmpi sge, %78, %80 : vector<4x32xi32>
    %c1_i32_45 = arith.constant 1 : i32
    %82 = vector.broadcast %c1_i32_45 : i32 to vector<4x32xi32>
    %83 = arith.addi %77, %82 : vector<4x32xi32>
    %c8_i32_46 = arith.constant 8 : i32
    %84 = vector.broadcast %c8_i32_46 : i32 to vector<4x32xi32>
    %85 = arith.muli %83, %84 : vector<4x32xi32>
    %86 = arith.cmpi slt, %78, %85 : vector<4x32xi32>
    %87 = arith.andi %81, %86 : vector<4x32xi1>
    %88 = arith.extui %87 : vector<4x32xi1> to vector<4x32xi32>
    %89 = arith.sitofp %88 : vector<4x32xi32> to vector<4x32xf32>
    %cst_47 = arith.constant dense<0.000000e+00> : vector<1x32xf32>
    %90 = tpu.matmul %69, %89, %cst_47 {dimension_numbers = #tpu.dot_dimension_numbers<[1], [0], [0], [1], [0, 0, 1, 1], [], []>} : vector<1x4xf32>, vector<4x32xf32>, vector<1x32xf32> -> vector<1x32xf32>
    %91 = arith.mulf %90, %25 : vector<1x32xf32>
    %92 = vector.shape_cast %73 : vector<1x16x4xf32> to vector<16x4xf32>
    %cst_48 = arith.constant dense<0.000000e+00> : vector<16x32xf32>
    %93 = tpu.matmul %92, %89, %cst_48 {dimension_numbers = #tpu.dot_dimension_numbers<[1], [0], [0], [1], [0, 0, 1, 1], [], []>} : vector<16x4xf32>, vector<4x32xf32>, vector<16x32xf32> -> vector<16x32xf32>
    %94 = arith.mulf %93, %35 : vector<16x32xf32>
    %95 = vector.shape_cast %94 : vector<16x32xf32> to vector<1x16x32xf32>
    %cst_49 = arith.constant dense<0.000000e+00> : vector<1x32xf32>
    %96 = vector.multi_reduction <add>, %95, %cst_49 [1] : vector<1x16x32xf32> to vector<1x32xf32>
    %97 = arith.addf %91, %96 : vector<1x32xf32>
    %cst_50 = arith.constant dense<0.000000e+00> : vector<1x32xf32>
    %98 = tpu.matmul %76, %89, %cst_50 {dimension_numbers = #tpu.dot_dimension_numbers<[1], [0], [0], [1], [0, 0, 1, 1], [], []>} : vector<1x4xf32>, vector<4x32xf32>, vector<1x32xf32> -> vector<1x32xf32>
    %99 = arith.mulf %97, %98 : vector<1x32xf32>
    %c0_51 = arith.constant 0 : index
    %c0_52 = arith.constant 0 : index
    %100 = vector.load %arg11[%c0_51, %c0_52] : memref<32x32xf32, #tpu.memory_space<vmem>>, vector<32x32xf32>
    %cst_53 = arith.constant dense<0.000000e+00> : vector<1x32xf32>
    %101 = tpu.matmul %99, %100, %cst_53 {dimension_numbers = #tpu.dot_dimension_numbers<[1], [0], [0], [1], [0, 0, 1, 1], [], []>} : vector<1x32xf32>, vector<32x32xf32>, vector<1x32xf32> -> vector<1x32xf32>
    %c0_54 = arith.constant 0 : index
    %c0_55 = arith.constant 0 : index
    %102 = vector.load %arg12[%c0_54, %c0_55] : memref<1x32xf32, #tpu.memory_space<vmem>>, vector<1x32xf32>
    %103 = arith.addf %101, %102 : vector<1x32xf32>
    %104 = arith.addf %7, %103 : vector<1x32xf32>
    %cst_56 = arith.constant dense<0.000000e+00> : vector<1xf32>
    %105 = vector.multi_reduction <add>, %104, %cst_56 [1] : vector<1x32xf32> to vector<1xf32>
    %106 = vector.shape_cast %105 : vector<1xf32> to vector<1x1xf32>
    %cst_57 = arith.constant 3.200000e+01 : f32
    %107 = vector.broadcast %cst_57 : f32 to vector<1x1xf32>
    %108 = arith.divf %106, %107 : vector<1x1xf32>
    %109 = vector.broadcast %108 : vector<1x1xf32> to vector<1x32xf32>
    %110 = arith.subf %104, %109 : vector<1x32xf32>
    %111 = arith.mulf %110, %110 : vector<1x32xf32>
    %cst_58 = arith.constant dense<0.000000e+00> : vector<1xf32>
    %112 = vector.multi_reduction <add>, %111, %cst_58 [1] : vector<1x32xf32> to vector<1xf32>
    %113 = vector.shape_cast %112 : vector<1xf32> to vector<1x1xf32>
    %cst_59 = arith.constant 3.200000e+01 : f32
    %114 = vector.broadcast %cst_59 : f32 to vector<1x1xf32>
    %115 = arith.divf %113, %114 : vector<1x1xf32>
    %116 = vector.broadcast %108 : vector<1x1xf32> to vector<1x32xf32>
    %117 = arith.subf %104, %116 : vector<1x32xf32>
    %cst_60 = arith.constant 9.99999974E-6 : f32
    %118 = vector.broadcast %cst_60 : f32 to vector<1x1xf32>
    %119 = arith.addf %115, %118 : vector<1x1xf32>
    %120 = math.rsqrt %119 : vector<1x1xf32>
    %121 = vector.broadcast %120 : vector<1x1xf32> to vector<1x32xf32>
    %122 = arith.mulf %117, %121 : vector<1x32xf32>
    %c0_61 = arith.constant 0 : index
    %c0_62 = arith.constant 0 : index
    %123 = vector.load %arg13[%c0_61, %c0_62] : memref<1x32xf32, #tpu.memory_space<vmem>>, vector<1x32xf32>
    %124 = arith.mulf %122, %123 : vector<1x32xf32>
    %c0_63 = arith.constant 0 : index
    %c0_64 = arith.constant 0 : index
    %125 = vector.load %arg14[%c0_63, %c0_64] : memref<1x32xf32, #tpu.memory_space<vmem>>, vector<1x32xf32>
    %126 = arith.addf %124, %125 : vector<1x32xf32>
    %c0_65 = arith.constant 0 : index
    %c0_66 = arith.constant 0 : index
    %c0_67 = arith.constant 0 : index
    %127 = vector.load %arg15[%c0_65, %c0_66, %c0_67] : memref<1x1x32xf32, #tpu.memory_space<vmem>>, vector<1x1x32xf32>
    %128 = vector.shape_cast %127 : vector<1x1x32xf32> to vector<1x32xf32>
    %129 = vector.shape_cast %126 : vector<1x32xf32> to vector<1x1x32xf32>
    tpu.vector_store %arg15[%c0_65, %c0_66, %c0_67], %129 {strides = array<i32>} : memref<1x1x32xf32, #tpu.memory_space<vmem>>, vector<1x1x32xf32>,
    return
  }
  func.func @transform_0(%arg0: i32) -> (i32, i32, i32) {
    %c0_i32 = arith.constant 0 : i32
    %c0_i32_0 = arith.constant 0 : i32
    %c0_i32_1 = arith.constant 0 : i32
    return %arg0, %c0_i32, %c0_i32_0 : i32, i32, i32
  }
  func.func @transform_1(%arg0: i32) -> (i32, i32, i32) {
    %c0_i32 = arith.constant 0 : i32
    %c0_i32_0 = arith.constant 0 : i32
    %c0_i32_1 = arith.constant 0 : i32
    return %arg0, %c0_i32, %c0_i32_0 : i32, i32, i32
  }
  func.func @transform_2(%arg0: i32) -> (i32, i32) {
    %c0_i32 = arith.constant 0 : i32
    %c0_i32_0 = arith.constant 0 : i32
    %c0_i32_1 = arith.constant 0 : i32
    return %c0_i32, %c0_i32_0 : i32, i32
  }
  func.func @transform_3(%arg0: i32) -> (i32, i32) {
    %c0_i32 = arith.constant 0 : i32
    %c0_i32_0 = arith.constant 0 : i32
    %c0_i32_1 = arith.constant 0 : i32
    return %c0_i32, %c0_i32_0 : i32, i32
  }
  func.func @transform_4(%arg0: i32) -> (i32, i32) {
    %c0_i32 = arith.constant 0 : i32
    %c0_i32_0 = arith.constant 0 : i32
    %c0_i32_1 = arith.constant 0 : i32
    return %c0_i32, %c0_i32_0 : i32, i32
  }
  func.func @transform_5(%arg0: i32) -> (i32, i32) {
    %c0_i32 = arith.constant 0 : i32
    %c0_i32_0 = arith.constant 0 : i32
    %c0_i32_1 = arith.constant 0 : i32
    return %c0_i32, %c0_i32_0 : i32, i32
  }
  func.func @transform_6(%arg0: i32) -> (i32, i32) {
    %c0_i32 = arith.constant 0 : i32
    %c0_i32_0 = arith.constant 0 : i32
    %c0_i32_1 = arith.constant 0 : i32
    return %c0_i32, %c0_i32_0 : i32, i32
  }
  func.func @transform_7(%arg0: i32) -> (i32, i32) {
    %c0_i32 = arith.constant 0 : i32
    %c0_i32_0 = arith.constant 0 : i32
    %c0_i32_1 = arith.constant 0 : i32
    return %c0_i32, %c0_i32_0 : i32, i32
  }
  func.func @transform_8(%arg0: i32) -> (i32, i32) {
    %c0_i32 = arith.constant 0 : i32
    %c0_i32_0 = arith.constant 0 : i32
    %c0_i32_1 = arith.constant 0 : i32
    return %c0_i32, %c0_i32_0 : i32, i32
  }
  func.func @transform_9(%arg0: i32) -> (i32, i32) {
    %c0_i32 = arith.constant 0 : i32
    %c0_i32_0 = arith.constant 0 : i32
    %c0_i32_1 = arith.constant 0 : i32
    return %c0_i32, %c0_i32_0 : i32, i32
  }
  func.func @transform_10(%arg0: i32) -> (i32, i32) {
    %c0_i32 = arith.constant 0 : i32
    %c0_i32_0 = arith.constant 0 : i32
    %c0_i32_1 = arith.constant 0 : i32
    return %c0_i32, %c0_i32_0 : i32, i32
  }
  func.func @transform_11(%arg0: i32) -> (i32, i32) {
    %c0_i32 = arith.constant 0 : i32
    %c0_i32_0 = arith.constant 0 : i32
    %c0_i32_1 = arith.constant 0 : i32
    return %c0_i32, %c0_i32_0 : i32, i32
  }
  func.func @transform_12(%arg0: i32) -> (i32, i32) {
    %c0_i32 = arith.constant 0 : i32
    %c0_i32_0 = arith.constant 0 : i32
    %c0_i32_1 = arith.constant 0 : i32
    return %c0_i32, %c0_i32_0 : i32, i32
  }
  func.func @transform_13(%arg0: i32) -> (i32, i32) {
    %c0_i32 = arith.constant 0 : i32
    %c0_i32_0 = arith.constant 0 : i32
    %c0_i32_1 = arith.constant 0 : i32
    return %c0_i32, %c0_i32_0 : i32, i32
  }
  func.func @transform_14(%arg0: i32) -> (i32, i32, i32) {
    %c0_i32 = arith.constant 0 : i32
    %c0_i32_0 = arith.constant 0 : i32
    %c0_i32_1 = arith.constant 0 : i32
    return %arg0, %c0_i32, %c0_i32_0 : i32, i32, i32
  }
}

</mosaic_0001>

<bundles_post_ra>
// kernel: tpu_custom_call.1
= control target key start
LH: loop header
LB: loop body
LE: loop exit
PB: predicated region body
PF: predicated region fallthrough
CT: control target
= control target key end

     0   :  { %s1886_s0 = inlined_call_operand.vmem [shape: f32[2,16,32], index: 0, kind: input, shape index: {}]   ;;  %s1887_s1 = inlined_call_operand.vmem [shape: f32[2,16,1], index: 1, kind: input, shape index: {}]   ;;  %s1888_s2 = inlined_call_operand.vmem [shape: f32[1,32], index: 2, kind: input, shape index: {}]   ;;  %s1889_s3 = inlined_call_operand.hbm [shape: f32[16,32], index: 3, kind: input, shape index: {}]   ;;  %s1890_s4 = inlined_call_operand.hbm [shape: f32[32,32], index: 4, kind: input, shape index: {}]   ;;  %s1891_s5 = inlined_call_operand.vmem [shape: f32[1,32], index: 5, kind: input, shape index: {}]   ;;  %s1892_s6 = inlined_call_operand.hbm [shape: f32[32,32], index: 6, kind: input, shape index: {}]   ;;  %s1893_s7 = inlined_call_operand.vmem [shape: f32[1,32], index: 7, kind: input, shape index: {}]   ;;  %s1894_s8 = inlined_call_operand.hbm [shape: f32[32,32], index: 8, kind: input, shape index: {}]   ;;  %s1895_s9 = inlined_call_operand.vmem [shape: f32[1,32], index: 9, kind: input, shape index: {}]   ;;  %s1896_s10 = inlined_call_operand.hbm [shape: f32[32,32], index: 10, kind: input, shape index: {}]   ;;  %s1897_s11 = inlined_call_operand.vmem [shape: f32[1,32], index: 11, kind: input, shape index: {}]   ;;  %s1898_s12 = inlined_call_operand.vmem [shape: f32[1,32], index: 12, kind: input, shape index: {}]   ;;  %s1899_s13 = inlined_call_operand.vmem [shape: f32[1,32], index: 13, kind: input, shape index: {}]   ;;  %s1900_s14 = inlined_call_operand.hbm [shape: f32[2,1,32], index: 14, kind: output, shape index: {}]  }
   0x1   :  { %1909 = sst [smem:[#allocation23_spill]] %s1890_s4 }
   0x2   :  { %1910 = sst [smem:[#allocation24_spill]] %s1894_s8 }
   0x3   :  { %1911 = sst [smem:[#allocation25_spill]] %s1899_s13 }
   0x4   :  { %19 = vsyncpa [#allocation3], 0 }
   0x5   :  { %20 = vsyncpa [#allocation6], 0 }
   0x6   :  { %21 = vsyncpa [#allocation9], 0 }
   0x7   :  { %22 = vsyncpa [#allocation4], 0 }
   0x8   :  { %24 = vsyncpa [#allocation4 + $0x1], 0  ;;  %s1658_s29 = smov 0   ;;  %s1660_s30 = smov 0  }
   0x9   :  { %s1662_s15 = smov 0   ;;  %s1664_s16 = smov 0  }
   0xa LB: > { %1912 = sst [smem:[#allocation16_spill]] %s1557_s29  ;;  %s1679_s17 = sadd.s32 4294967295, %s1569_s16   ;;  %s1569_s16 = sphi %s1664_s16, %s1930_s16   ;;  %s1565_s15 = sphi %s1662_s15, %s1932_s15   ;;  %s1561_s30 = sphi %s1660_s30, %s1934_s30   ;;  %s1557_s29 = sphi %s1658_s29, %s1933_s29  }
   0xb   : > { %1913 = sst [smem:[#allocation17_spill]] %s1565_s15  ;;  %s1177_s18 = sadd.s32 4294967294, %s1569_s16  }
   0xc   : > { %1914 = sst [smem:[#allocation18_spill]] %s1569_s16  ;;  %s1683_s19 = sadd.s32 1, %s1569_s16  }
   0xd   : > { %1915 = sst [smem:[#allocation19_spill]] %s1683_s19  ;;  %s341_s20 = sadd.s32 1, %s1565_s15 }
   0xe   : > { %s338_s21 = ssub.s32 %s1569_s16, %s1683_s19  ;;  %p351_p0 = scmp.ne.s32.totalorder %s1565_s15, %s1561_s30 }
   0xf   : > { %p339_p1 = scmp.eq.s32.totalorder %s338_s21, 0  ;;  %p352_p2 = scmp.eq.s32.totalorder %s1679_s17, 1 }
  0x10   : > { %p357_p3 = scmp.ne.s32.totalorder %s1561_s30, %s1557_s29  ;;  %p358_p4 = scmp.eq.s32.totalorder %s1177_s18, 1 }
  0x11   : > { %s1694_s22 = scalar_select %p339_p1, %s1565_s15, %s341_s20  }
  0x12   : > { %p1696_p5 = por %p352_p2, %p351_p0  ;;  %p1700_p6 = por %p358_p4, %p357_p3 }
  0x13   : > { %1916 = sst [smem:[#allocation20_spill]] %s1694_s22  ;;  %p1178_p7 = scmp.ge.s32.totalorder %s1569_s16, 1 }
  0x14   : > { %s1917_s23 = scalar_select %p1696_p5, 1, 0 }
  0x15   : > { %s1919_s24 = scalar_select %p1700_p6, 1, 0 }
  0x16   : > { %1918 = sst [smem:[#allocation21_spill]] %s1917_s23  ;;  %p365_p8 = scmp.lt.s32.totalorder %s1569_s16, 3 }
  0x17   : > { %1920 = sst [smem:[#allocation22_spill]] %s1919_s24  ;;  %p1272_p9 = scmp.eq.s32.totalorder %s1679_s17, 0 }
  0x18   : > { %p1707_p10 = pnand %p1178_p7, %p365_p8  ;;  %s1922_s4 = sld [smem:[#allocation23_spill]] }
  0x19   : > { %s1923_s8 = sld [smem:[#allocation24_spill]]  ;;  %s1571_s15 = smov [#allocation5]  }
  0x1a   : > { %p1252_p11 = pneg %p1707_p10  ;;  %s395_s19 = sshll.u32 %s1571_s15, 4  ;;  %s396_s19 = int_to_ptr.vmem [resolvable:$true] %s395_s19 }
  0x1b   : > { %s1572_s26 = smov 128   ;;  %s1573_s27 = smov 8  }
  0x1c   : > { %p1721_p12 = pnand %p1272_p9, %p1252_p11  ;;  %s379_s24 = sshll.u32 %s1889_s3, 4  ;;  %s380_s24 = int_to_ptr.hbm [resolvable:$true] %s379_s24 }
  0x1d   : > { %s410_s16 = sshll.u32 %s1892_s6, 4  ;;  %s1575_s13 = smov [#allocation2]   ;;  %s411_s16 = int_to_ptr.hbm [resolvable:$true] %s410_s16 }
  0x1e   : > { %s393_s28 = sshll.u32 %s1922_s4, 4  ;;  %s1574_s4 = smov [#allocation8]   ;;  %s394_s28 = int_to_ptr.hbm [resolvable:$true] %s393_s28 }
  0x1f   : > { %s427_s21 = sshll.u32 %s1923_s8, 4  ;;  %s429_s18 = sshll.u32 %s1574_s4, 4  ;;  %s428_s21 = int_to_ptr.hbm [resolvable:$true] %s427_s21  ;;  %s430_s18 = int_to_ptr.vmem [resolvable:$true] %s429_s18 }
  0x20   : > { %1258 = dma.hbm_to_vmem [thread:$0]  (!%p1721_p12), %s394_s28, 512, %s396_s19, [#allocation6], %s1572_s26, %s1572_s26, %s1573_s27  }
  0x21   : > { %1264 = dma.hbm_to_vmem [thread:$0]  (!%p1721_p12), %s428_s21, 512, %s430_s18, [#allocation9], %s1572_s26, %s1572_s26, %s1573_s27  }
  0x22   : > { %s381_s23 = sshll.u32 %s1575_s13, 4  ;;  %s1576_s4 = smov [#allocation7]   ;;  %s382_s23 = int_to_ptr.vmem [resolvable:$true] %s381_s23 }
  0x23   : > { %1255 = dma.hbm_to_vmem [thread:$0]  (!%p1721_p12), %s380_s24, 256, %s382_s23, [#allocation3], %s1572_s26, %s1572_s26, %s1573_s27  }
  0x24   : > { %s412_s19 = sshll.u32 %s1576_s4, 4  ;;  %s444_s20 = sshll.u32 %s1896_s10, 4  ;;  %s413_s19 = int_to_ptr.vmem [resolvable:$true] %s412_s19  ;;  %s445_s20 = int_to_ptr.hbm [resolvable:$true] %s444_s20 }
  0x25   : > { %1261 = dma.hbm_to_vmem [thread:$0]  (!%p1721_p12), %s411_s16, 512, %s413_s19, [#allocation6], %s1572_s26, %s1572_s26, %s1573_s27  }
  0x26   : > { %s1577_s21 = smov [#allocation10]   ;;  %487 = sbr.rel (%p1707_p10) target bundleno = 942 (0x3ae), region = 76 }
  0x27   : > { %s446_s29 = sshll.u32 %s1577_s21, 4  ;;  %s447_s29 = int_to_ptr.vmem [resolvable:$true] %s446_s29 }
  0x28   : > { %1267 = dma.hbm_to_vmem [thread:$0]  (!%p1721_p12), %s445_s20, 512, %s447_s29, [#allocation9], %s1572_s26, %s1572_s26, %s1573_s27  }
  0x2b   : > { %1540 = dma.done.wait (%p1272_p9), [#allocation3], 256  }
  0x2c   : > { %1542 = vsyncadd (%p1272_p9), [#allocation3], 4294967040 }
  0x2d   : > { %1544 = dma.done.wait (%p1272_p9), [#allocation6], 1024  }
  0x2e   : > { %1546 = vsyncadd (%p1272_p9), [#allocation6], 4294966272 }
  0x2f   : > { %1548 = dma.done.wait (%p1272_p9), [#allocation9], 1024  }
  0x30   : > { %1550 = vsyncadd (%p1272_p9), [#allocation9], 4294966272  ;;  %p558_p13 = scmp.lt.s32.totalorder %s1679_s17, 1  ;;  %v1578_v0 = vmov 16.0   ;;  %vm575_vm0 = vcmask 261120   ;;  %v638_v2 = vld [vmem:[#allocation7 + $0x18] sm:$0xff]  ;;  %v743_v35 = vlaneseq  ;;  %s1056_s18 = scalar_lea.hbm %s1900_s14, %s1679_s17 }
  0x31   : > { %1331 = vrcp.f32 %v1578_v0  ;;  %v637_v3 = vld [vmem:[#allocation7 + $0x10] sm:$0xff]  ;;  %706 = vmatpush.msra.mxu3 %v638_v2  ;;  %v636_v4 = vld [vmem:[#allocation7 + $0x8] sm:$0xff]  ;;  %652 = vmatpush.msra.mxu1 %v638_v2  ;;  %v610_v9 = vld [vmem:[#allocation5 + $0x18] sm:$0xff]  ;;  %v1579_v45 = vmov 1.0   ;;  %vm596_vm10 = vcmask 7168   ;;  %v1580_v58 = vmov 0  }
  0x32   : > { %s1760_s13 = scalar_select %p558_p13, %s1679_s17, 1  ;;  %v573_v6 = vld [vmem:[#allocation2] sm:$0xff]  ;;  %627 = vmatpush.msra.mxu0 %v610_v9  ;;  %v635_v14 = vld [vmem:[#allocation7] sm:$0xff]  ;;  %v608_v17 = vld [vmem:[#allocation5 + $0x8] sm:$0xff]  ;;  %v1784_v36 = vand.u32 127, %v743_v35  ;;  %v1786_v37 = vshrl.u32 %v743_v35, 7  ;;  %1328 = vset.pattern.permute.xlu1 %v1580_v58 }
  0x33   : > { %v609_v10 = vld [vmem:[#allocation5 + $0x10] sm:$0xff]  ;;  %707 = vmatpush.msra.mxu3 %v637_v3  ;;  %653 = vmatpush.msra.mxu1 %v637_v3  ;;  %v663_v18 = vld [vmem:[#allocation8 + $0x18] sm:$0xff]  ;;  %v607_v20 = vld [vmem:[#allocation5] sm:$0xff]  ;;  %s556_s25 = sand.u32 1, %s1561_s30   ;;  %s1926_s20 = sld [smem:[#allocation25_spill]] }
  0x34   : > { %s1228_s16 = sshll.u32 %s1760_s13, 4  ;;  %628 = vmatpush.msra.mxu0 %v609_v10  ;;  %677 = vmatpush.msra.mxu2 %v663_v18  ;;  %v662_v21 = vld [vmem:[#allocation8 + $0x10] sm:$0xff]  ;;  %v574_v24 = vld [vmem:[#allocation2 + $0x8] sm:$0xff]  ;;  %v755_v38 = vadd.s32 1, %v1784_v36  ;;  %v661_v39 = vld [vmem:[#allocation8 + $0x8] sm:$0xff]  ;;  %v750_v41 = vmul.u32 8, %v1784_v36 }
  0x35   : > { %s562_s24 = scalar_lea.vmem %s1886_s0, %s1228_s16  ;;  %708 = vmatpush.msra.mxu3 %v636_v4  ;;  %654 = vmatpush.msra.mxu1 %v636_v4  ;;  %v572_v32 = vld [vmem:[%s1888_s2] sm:$0x1]  ;;  %v660_v40 = vld [vmem:[#allocation8] sm:$0xff]  ;;  %v747_v42 = vadd.s32 24, %v1786_v37  ;;  %v746_v44 = vadd.s32 16, %v1786_v37  ;;  %s567_s15 = scalar_lea.vmem %s1887_s1, %s1228_s16  ;;  %v745_v46 = vadd.s32 8, %v1786_v37 }
  0x36   : > { %v568_v5 = vld [vmem:[%s562_s24] sm:$0xff]  ;;  %v569_v11 = vld [vmem:[%s562_s24 + $0x8] sm:$0xff]  ;;  %629 = vmatpush.msra.mxu0 %v608_v17  ;;  %678 = vmatpush.msra.mxu2 %v662_v21  ;;  %v756_v43 = vmul.u32 8, %v755_v38  ;;  %vm751_vm12 = vcmp.ge.s32.totalorder %v1786_v37, %v750_v41  ;;  %s557_s21 = scalar_lea.vmem [#allocation11], %s556_s25  ;;  %s1060_s13 = sshll.u32 %s1056_s18, 4  ;;  %s1061_s13 = int_to_ptr.hbm [resolvable:$true] %s1060_s13 }
  0x37   : > { %v1332_v1 = vpop.eup %1331  ;;  %v576_v8 = vsel %vm575_vm0, %v568_v5, 0.0  ;;  %v577_v12 = vsel %vm575_vm0, %v569_v11, 0.0  ;;  %v594_v15 = vadd.f32 %v573_v6, %v568_v5  ;;  %709 = vmatpush.msra.mxu3 %v635_v14  ;;  %655 = vmatpush.msra.mxu1 %v635_v14  ;;  %v595_v28 = vadd.f32 %v574_v24, %v569_v11  ;;  %v570_v47 = vld [vmem:[%s567_s15] sm:$0xff]  ;;  %v571_v48 = vld [vmem:[%s567_s15 + $0x8] sm:$0xff]  ;;  %s1058_s29 = sshll.u32 %s557_s21, 4  ;;  %s1048_s17 = scalar_lea.sflag [#allocation4], %s556_s25  ;;  %s1059_s29 = int_to_ptr.vmem [resolvable:$true] %s1058_s29 }
  0x38   : > { %v586_v7 = vmul.f32 16.0, %v1332_v1  ;;  %v578_v16 = vadd.f32 %v577_v12, %v576_v8  ;;  %630 = vmatpush.msra.mxu0 %v607_v20  ;;  %vm590_vm1 = vweird.f32 %v1332_v1  ;;  %679 = vmatpush.msra.mxu2 %v661_v39  ;;  %vm754_vm2 = vcmp.ge.s32.totalorder %v747_v42, %v750_v41  ;;  %v1329_v61 = vld [vmem:[%s1893_s7] ss:$0 sm:$0xff]  ;;  %s1509_s16 = sshra.s32 %s1061_s13, 4  ;;  %s1515_s26 = scalar_lea.hbm %s1900_s14, 2  ;;  %s1510_s16 = int_to_ptr.hbm [resolvable:$true] %s1509_s16 }
  0x39   : > { %1198 = vmatmul.msk.f32.vlgmr.msra.gmra.mxu3 %vm575_vm0, %v594_v15  ;;  %vm760_vm3 = vcmp.lt.s32.totalorder %v747_v42, %v756_v43  ;;  %vm753_vm5 = vcmp.ge.s32.totalorder %v746_v44, %v750_v41  ;;  %vm759_vm6 = vcmp.lt.s32.totalorder %v746_v44, %v756_v43  ;;  %vm752_vm8 = vcmp.ge.s32.totalorder %v745_v46, %v750_v41  ;;  %v639_v62 = vld [vmem:[%s1893_s7] sm:$0x1]  ;;  %s1511_s22 = scalar_lea.hbm %s1510_s16, 1  ;;  %p1516_p3 = scmp.lt.s32.totalorder %s1510_s16, %s1900_s14 }
  0x3a   : > { %v587_v13 = vsub.f32 1.0, %v586_v7  ;;  %v579_v19 = vrot.slane %v578_v16, 4  ;;  %732 = vmatpush.msrb.mxu0 %v663_v18  ;;  %680 = vmatpush.msra.mxu2 %v660_v40  ;;  %vm764_vm4 = vmand %vm754_vm2, %vm760_vm3  ;;  %vm758_vm9 = vcmp.lt.s32.totalorder %v745_v46, %v756_v43  ;;  %v598_v49 = vsel %vm596_vm10, %v571_v48, 0.0  ;;  %v611_v63 = vld [vmem:[%s1891_s5] sm:$0x1]  ;;  %p1512_p0 = scmp.ne.s32.totalorder %s1510_s16, %s1511_s22  ;;  %p1517_p4 = scmp.lt.s32.totalorder %s1515_s26, %s1511_s22 }
  0x3b   : > { %1206 = vmatpush.msk.msrb.mxu1 %vm764_vm4, %v1579_v45  ;;  %vm763_vm7 = vmand %vm753_vm5, %vm759_vm6  ;;  %v597_v50 = vsel %vm596_vm10, %v570_v47, 0.0  ;;  %vm757_vm13 = vcmp.lt.s32.totalorder %v1786_v37, %v756_v43  ;;  %1327 = vset.pattern.permute.xlu0 %v1580_v58  ;;  %v884_v14 = vadd.s32 1, %v1786_v37  ;;  %vm893_vm3 = vcmask 1043456  }
  0x3c   : > { %v588_v22 = vmul.f32 %v1332_v1, %v587_v13  ;;  %v580_v23 = vadd.f32 %v579_v19, %v578_v16  ;;  %733 = vmatpush.msrb.mxu0 %v662_v21  ;;  %1211 = vmatpush.msk.msrb.mxu2 %vm764_vm4, %v1579_v45  ;;  %vm762_vm11 = vmand %vm752_vm8, %vm758_vm9  ;;  %v599_v51 = vadd.f32 %v598_v49, %v597_v50  ;;  %v1581_v19 = vmov 0.0   ;;  %p1513_p1 = pnand %p1512_p0, %p1696_p5  ;;  %p1518_p7 = por %p1517_p4, %p1516_p3 }
  0x3d   : > { %1207 = vmatpush.msk.msrb.mxu1 %vm763_vm7, %v1579_v45  ;;  %vm761_vm14 = vmand %vm751_vm12, %vm757_vm13  ;;  %840 = vperm.xlu0 %1327, %v570_v47   ;;  %v885_v16 = vmul.u32 8, %v884_v14  ;;  %vm850_vm4 = vcmask 31744   ;;  %vm1012_vm5 = vcmask 253952  }
  0x3e   : > { %v581_v25 = vrot.slane %v580_v23, 2  ;;  %v589_v26 = vadd.f32 %v1332_v1, %v588_v22  ;;  %734 = vmatpush.msrb.mxu0 %v661_v39  ;;  %1212 = vmatpush.msk.msrb.mxu2 %vm763_vm7, %v1579_v45  ;;  %v600_v52 = vrot.slane %v599_v51, 4  ;;  %p1514_p2 = pneg %p1513_p1 }
  0x3f   : > { %1208 = vmatpush.msk.msrb.mxu1 %vm762_vm11, %v1579_v45 }
  0x40   : > { %v582_v27 = vadd.f32 %v581_v25, %v580_v23  ;;  %v1771_v30 = vsel %vm590_vm1, %v1332_v1, %v589_v26  ;;  %735 = vmatpush.msrb.mxu0 %v660_v40  ;;  %1213 = vmatpush.msk.msrb.mxu2 %vm762_vm11, %v1579_v45  ;;  %v601_v53 = vadd.f32 %v600_v52, %v599_v51  ;;  %p1519_p8 = pnand %p1518_p7, %p1514_p2 }
  0x41   : > { %1199 = vmatmul.msk.f32.gmra.mxu3 %vm575_vm0, %v595_v28  ;;  %1209 = vmatpush.msk.msrb.mxu1 %vm761_vm14, %v1579_v45  ;;  %vm886_vm1 = vcmp.lt.s32.totalorder %v1784_v36, %v885_v16 }
  0x42   : > { %v583_v29 = vrot.slane %v582_v27, 1  ;;  %1214 = vmatpush.msk.msrb.mxu2 %vm761_vm14, %v1579_v45  ;;  %v602_v54 = vrot.slane %v601_v53, 2 }
  0x44   : > { %v584_v31 = vadd.f32 %v583_v29, %v582_v27  ;;  %v603_v55 = vadd.f32 %v602_v54, %v601_v53 }
  0x45   : > { %845 = vperm.xlu0 %1327, %v571_v48  }
  0x46   : > { %v592_v33 = vmul.f32 %v1771_v30, %v584_v31  ;;  %v604_v56 = vrot.slane %v603_v55, 1 }
  0x48   : > { %v1778_v34 = vadd.f32 %v592_v33, %v572_v32  ;;  %v605_v57 = vadd.f32 %v604_v56, %v603_v55 }
  0x4a   : > { %1195 = vmatmul.msk.f32.vlgmr.msra.gmra.mxu0 %vm575_vm0, %v1778_v34  ;;  %1196 = vmatmul.msk.f32.vlgmr.msra.gmra.mxu1 %vm575_vm0, %v1778_v34  ;;  %v606_v59 = vmul.f32 %v605_v57, %v1771_v30 }
  0x4b   : > { %1197 = vmatmul.msk.f32.vlgmr.msra.gmra.mxu2 %vm575_vm0, %v1778_v34 }
  0x4c   : > { %800 = vperm.xlu1 %1328, %v606_v59  }
  0x52   : > { %1200 = vmatmul.msk.f32.vlgmr.msrb.gmra.mxu0 %vm575_vm0, %v594_v15  ;;  %v882_v15 = vmul.u32 8, %v1786_v37 }
  0x54   : > { %vm883_vm15 = vcmp.ge.s32.totalorder %v1784_v36, %v882_v15 }
  0x55   : > { %vm887_vm2 = vmand %vm883_vm15, %vm886_vm1 }
  0x56   : > { %v1217_v20 = vsel %vm887_vm2, 1.0, %v1581_v19 }
  0x57   : > { %1220 = vmatpush.msk.msrb.mxu3 %vm893_vm3, %v1217_v20  ;;  %1218 = vmatpush.msk.msra.mxu1 %vm893_vm3, %v1217_v20 }
  0x58   : > { %1223 = vmatpush.msk.msra.mxu0 %vm893_vm3, %v1217_v20 }
  0x5a   : > { %1201 = vmatmul.msk.f32.gmra.mxu0 %vm575_vm0, %v595_v28 }
  0xaf   : > { %v841_v12 = vpop.permute.xlu0 %840 }
  0xb7   : > { %v846_v23 = vpop.permute.xlu0 %845 }
  0xbc   : > { %v711_v60 = vpop.f32.mrf.mxu3 }
  0xbd   : > { %v712_v2 = vadd.f32 %v1329_v61, %v711_v60 }
  0xbe   : > { %v801_v35 = vpop.permute.xlu1 %800 }
  0xc4   : > { %v714_v8 = vpop.f32.mrf.mxu3 }
  0xc5   : > { %v715_v9 = vadd.f32 %v1329_v61, %v714_v8  ;;  %v986_v61 = vld [vmem:[#allocation10 + $0x18] sm:$0xff] }
  0xc7   : > { %v632_v0 = vpop.f32.mrf.mxu0  ;;  %v657_v1 = vpop.f32.mrf.mxu1 }
  0xc8   : > { %v633_v3 = vadd.f32 %v632_v0, %v611_v63  ;;  %v658_v4 = vadd.f32 %v657_v1, %v639_v62  ;;  %v985_v63 = vld [vmem:[#allocation10 + $0x10] sm:$0xff]  ;;  %v984_v0 = vld [vmem:[#allocation10 + $0x8] sm:$0xff]  ;;  %v983_v1 = vld [vmem:[#allocation10] sm:$0xff] }
  0xca   : > { %v804_v5 = vperm.slane %v633_v3, 0  ;;  %v773_v6 = vmul.f32 %v658_v4, %v633_v3 }
  0xcc   : > { %v805_v7 = vmul.f32 %v804_v5, %v712_v2  ;;  %1210 = vmatmul.msk.f32.vlgmr.msrb.gmra.mxu1 %vm575_vm0, %v773_v6  ;;  %v806_v10 = vmul.f32 %v804_v5, %v715_v9  ;;  %v1330_v2 = vld [vmem:[%s1895_s9] ss:$0 sm:$0xff] }
  0xcd   : > { %1003 = vmatpush.msrb.mxu1 %v986_v61 }
  0xce   : > { %1215 = vmatmul.msk.f32.vlgmr.msrb.gmra.mxu2 %vm575_vm0, %v805_v7  ;;  %v1817_v11 = vpop.f32.mrf.mxu2 }
  0xcf   : > { %v737_v62 = vpop.f32.mrf.mxu0  ;;  %1004 = vmatpush.msrb.mxu1 %v985_v63 }
  0xd0   : > { %v738_v5 = vadd.f32 %v1330_v2, %v737_v62 }
  0xd1   : > { %1005 = vmatpush.msrb.mxu1 %v984_v0 }
  0xd3   : > { %1006 = vmatpush.msrb.mxu1 %v983_v1 }
  0xd6   : > { %1216 = vmatmul.msk.f32.gmra.mxu2 %vm575_vm0, %v806_v10 }
  0xd7   : > { %v740_v4 = vpop.f32.mrf.mxu0 }
  0xd8   : > { %v741_v6 = vadd.f32 %v1330_v2, %v740_v4 }
 0x149   : > { %v794_v30 = vpop.f32.mrf.mxu1 }
 0x14a   : > { %v797_v32 = vmul.f32 0.35355338, %v794_v30 }
 0x14c   : > { %v803_v37 = vadd.f32 %v801_v35, %v797_v32 }
 0x151   : > { %v830_v13 = vpop.f32.mrf.mxu2 }
 0x152   : > { %v836_v17 = vmul.f32 0.35355338, %v830_v13 }
 0x154   : > { %v848_v21 = vadd.f32 %v841_v12, %v836_v17  ;;  %v664_v17 = vld [vmem:[%s1895_s9] sm:$0x1] }
 0x155   : > { %v683_v20 = vadd.f32 %v1817_v11, %v664_v17  ;;  %v1582_v11 = vmov 32.0  }
 0x156   : > { %v851_v25 = vsel %vm850_vm4, %v848_v21, -inf }
 0x159   : > { %v833_v18 = vpop.f32.mrf.mxu2 }
 0x15a   : > { %v837_v22 = vmul.f32 0.35355338, %v833_v18 }
 0x15c   : > { %v849_v24 = vadd.f32 %v846_v23, %v837_v22 }
 0x15e   : > { %v852_v26 = vsel %vm850_vm4, %v849_v24, -inf }
 0x15f   : > { %v853_v27 = vmax.f32 %v851_v25, %v852_v26 }
 0x161   : > { %v854_v28 = vrot.slane %v853_v27, 4 }
 0x163   : > { %v855_v29 = vmax.f32 %v853_v27, %v854_v28  ;;  %v987_v27 = vld [vmem:[%s1897_s11] sm:$0x1] }
 0x165   : > { %v856_v31 = vrot.slane %v855_v29, 2 }
 0x167   : > { %v857_v33 = vmax.f32 %v855_v29, %v856_v31 }
 0x169   : > { %v858_v36 = vrot.slane %v857_v33, 1 }
 0x16b   : > { %v859_v38 = vmax.f32 %v857_v33, %v858_v36 }
 0x16d   : > { %v860_v39 = vmax.f32 %v859_v38, %v803_v37 }
 0x16f   : > { %v861_v40 = vsub.f32 %v803_v37, %v860_v39  ;;  %v864_v41 = vperm.slane %v860_v39, 0 }
 0x171   : > { %v862_v42 = vmul.f32 1.442695, %v861_v40  ;;  %v865_v43 = vsub.f32 %v848_v21, %v864_v41  ;;  %v866_v44 = vsub.f32 %v849_v24, %v864_v41 }
 0x173   : > { %1333 = vpow2.f32 %v862_v42  ;;  %v867_v45 = vmul.f32 1.442695, %v865_v43  ;;  %v869_v46 = vmul.f32 1.442695, %v866_v44 }
 0x175   : > { %1335 = vpow2.f32 %v867_v45 }
 0x176   : > { %1337 = vpow2.f32 %v869_v46 }
 0x179   : > { %v1334_v47 = vpop.eup %1333 }
 0x17a   : > { %1219 = vmatmul.msk.f32.vlgmr.msra.gmra.mxu1 %vm850_vm4, %v1334_v47 }
 0x17b   : > { %v1336_v48 = vpop.eup %1335 }
 0x17c   : > { %v1338_v49 = vpop.eup %1337  ;;  %v871_v50 = vsel %vm850_vm4, %v1336_v48, 0.0  ;;  %1221 = vmatmul.msk.f32.vlgmr.msrb.gmra.mxu3 %vm850_vm4, %v1336_v48 }
 0x17d   : > { %v872_v51 = vsel %vm850_vm4, %v1338_v49, 0.0 }
 0x17e   : > { %v873_v52 = vadd.f32 %v872_v51, %v871_v50 }
 0x180   : > { %v874_v53 = vrot.slane %v873_v52, 4 }
 0x182   : > { %v875_v54 = vadd.f32 %v874_v53, %v873_v52  ;;  %v1042_v52 = vld [vmem:[%s1898_s12] sm:$0x1] }
 0x184   : > { %v876_v55 = vrot.slane %v875_v54, 2  ;;  %1222 = vmatmul.msk.f32.gmra.mxu3 %vm850_vm4, %v1338_v49 }
 0x186   : > { %v877_v56 = vadd.f32 %v876_v55, %v875_v54  ;;  %v1044_v55 = vld [vmem:[%s1926_s20] sm:$0x1] }
 0x188   : > { %v878_v57 = vrot.slane %v877_v56, 1 }
 0x18a   : > { %v879_v58 = vadd.f32 %v878_v57, %v877_v56 }
 0x18c   : > { %v880_v59 = vadd.f32 %v1334_v47, %v879_v58 }
 0x18e   : > { %1339 = vrcp.f32 %v880_v59 }
 0x18f   : > { %1341 = vrcp.f32 %v1582_v11 }
 0x194   : > { %v1340_v60 = vpop.eup %1339 }
 0x195   : > { %1224 = vmatmul.msk.f32.vlgmr.msra.gmra.mxu0 %vm850_vm4, %v1340_v60  ;;  %v1342_v32 = vpop.eup %1341 }
 0x196   : > { %v1017_v33 = vmul.f32 32.0, %v1342_v32 }
 0x198   : > { %v1018_v35 = vsub.f32 1.0, %v1017_v33 }
 0x19a   : > { %v1019_v36 = vmul.f32 %v1342_v32, %v1018_v35 }
 0x19c   : > { %v1020_v37 = vadd.f32 %v1342_v32, %v1019_v36 }
 0x1f7   : > { %v914_v19 = vpop.f32.mrf.mxu1 }
 0x1f8   : > { %v917_v22 = vmul.f32 %v914_v19, %v683_v20 }
 0x1ff   : > { %v941_v3 = vpop.f32.mrf.mxu3 }
 0x200   : > { %v947_v7 = vmul.f32 %v941_v3, %v738_v5 }
 0x202   : > { %v949_v10 = vsel %vm575_vm0, %v947_v7, 0.0 }
 0x207   : > { %v944_v8 = vpop.f32.mrf.mxu3 }
 0x208   : > { %v948_v9 = vmul.f32 %v944_v8, %v741_v6 }
 0x20a   : > { %v950_v12 = vsel %vm575_vm0, %v948_v9, 0.0 }
 0x20b   : > { %v951_v13 = vadd.f32 %v950_v12, %v949_v10 }
 0x20d   : > { %v952_v14 = vrot.slane %v951_v13, 4 }
 0x20f   : > { %v953_v15 = vadd.f32 %v952_v14, %v951_v13 }
 0x211   : > { %v954_v16 = vrot.slane %v953_v15, 2 }
 0x212   : > { %v979_v25 = vpop.f32.mrf.mxu0 }
 0x213   : > { %v955_v18 = vadd.f32 %v954_v16, %v953_v15 }
 0x215   : > { %v956_v21 = vrot.slane %v955_v18, 1 }
 0x217   : > { %v957_v23 = vadd.f32 %v956_v21, %v955_v18 }
 0x219   : > { %v958_v24 = vadd.f32 %v957_v23, %v917_v22 }
 0x21b   : > { %v982_v26 = vmul.f32 %v979_v25, %v958_v24 }
 0x21d   : > { %1225 = vmatmul.msk.f32.vlgmr.msrb.gmra.mxu1 %vm575_vm0, %v982_v26  ;;  %vm1021_vm0 = vweird.f32 %v1342_v32 }
 0x21e   : > { %v1022_v38 = vsel %vm1021_vm0, %v1342_v32, %v1020_v37 }
 0x29a   : > { %v1008_v28 = vpop.f32.mrf.mxu1 }
 0x29b   : > { %v1009_v29 = vadd.f32 %v1008_v28, %v987_v27 }
 0x29d   : > { %v1011_v30 = vadd.f32 %v1009_v29, %v1778_v34 }
 0x29f   : > { %v1013_v31 = vsel %vm1012_vm5, %v1011_v30, 0.0 }
 0x2a0   : > { %1014 = vadd.xlane.f32.xlu1 %v1013_v31 }
 0x313   : > { %v1015_v39 = vpop.xlane.xlu1 %1014 }
 0x314   : > { %v1023_v40 = vmul.f32 %v1022_v38, %v1015_v39 }
 0x316   : > { %v1024_v41 = vsub.f32 %v1011_v30, %v1023_v40 }
 0x318   : > { %v1025_v42 = vmul.f32 %v1024_v41, %v1024_v41 }
 0x31a   : > { %v1026_v43 = vsel %vm1012_vm5, %v1025_v42, 0.0 }
 0x31b   : > { %1027 = vadd.xlane.f32.xlu2 %v1026_v43 }
 0x38e   : > { %v1028_v34 = vpop.xlane.xlu2 %1027 }
 0x38f   : > { %v1029_v44 = vmul.f32 %v1028_v34, %v1022_v38 }
 0x391   : > { %v1030_v45 = vadd.f32 1e-05, %v1029_v44 }
 0x393   : > { %1343 = vrsqrt.f32 %v1030_v45  ;;  %vm1037_vm7 = vweird.f32 %v1030_v45 }
 0x399   : > { %v1344_v46 = vpop.eup %1343 }
 0x39a   : > { %v1032_v47 = vmul.f32 %v1344_v46, %v1030_v45  ;;  %vm1038_vm6 = vweird.f32 %v1344_v46 }
 0x39b   : > { %vm1039_vm8 = vmor %vm1037_vm7, %vm1038_vm6 }
 0x39c   : > { %v1033_v48 = vmul.f32 %v1344_v46, %v1032_v47 }
 0x39e   : > { %v1034_v49 = vmul.f32 0.5, %v1033_v48 }
 0x3a0   : > { %v1035_v50 = vsub.f32 1.5, %v1034_v49 }
 0x3a2   : > { %v1036_v51 = vmul.f32 %v1344_v46, %v1035_v50 }
 0x3a4   : > { %v1040_v53 = vsel %vm1039_vm8, %v1344_v46, %v1036_v51 }
 0x3a5   : > { %v1041_v54 = vmul.f32 %v1040_v53, %v1024_v41 }
 0x3a7   : > { %v1043_v56 = vmul.f32 %v1042_v52, %v1041_v54 }
 0x3a9   : > { %v1045_v57 = vadd.f32 %v1044_v55, %v1043_v56 }
 0x3ab   : > { %1046 = vst.msk [vmem:[%s557_s21] sm:$0x1] %vm1012_vm5, %v1045_v57 }
 0x3ac   : > { %1522 = shalt.err (!%p1519_p8)
}
 0x3ad   : > { %1250 = dma.vmem_to_hbm [thread:$0]  (%p1696_p5), %s1059_s29, 16, %s1061_s13, %s1048_s17  }
 0x3ae PF: > { %s1927_s25 = sld [smem:[#allocation18_spill]] }
 0x3af   : > { %s1928_s15 = sld [smem:[#allocation16_spill]] }
 0x3b4   : > { %p1282_p9 = scmp.ge.s32.totalorder %s1927_s25, 2 }
 0x3b5   : > { %s1072_s28 = sand.u32 1, %s1928_s15  }
 0x3b6   : > { %p1269_p10 = pnand %p1282_p9, %p1700_p6  ;;  %s1073_s8 = scalar_lea.sflag [#allocation4], %s1072_s28 }
 0x3b8   : > { %p1270_p11 = pneg %p1269_p10 }
 0x3ba   : > { %1552 = dma.done.wait (%p1270_p11), %s1073_s8, 16  }
 0x3bb   : > { %1554 = vsyncadd (%p1270_p11), %s1073_s8, 4294967280  ;;  %s1930_s16 = sld [smem:[#allocation19_spill]]  ;;  %s1933_s29 = smov %s1561_s30 }
 0x3bc   : > { %s1931_s20 = sld [smem:[#allocation17_spill]] }
 0x3bd   : > { %s1932_s15 = sld [smem:[#allocation20_spill]] }
 0x3c1   : > { %p27_p12 = scmp.ge.s32.totalorder %s1930_s16, 4  }
 0x3c2   : > { %s1934_s30 = smov %s1931_s20 }
 0x3c3   :  { %29 = sbr.rel (!%p27_p12) target bundleno = 10 (0xa), region = 135 }
 0x3c8   :  { %1078 = vsyncpa [#allocation3], 1 }
 0x3c9   :  { %1080 = vsyncpa [#allocation3 + $0x1], 1 }
 0x3ca   :  { %1081 = vsyncpa [#allocation6], 1 }
 0x3cb   :  { %1082 = vsyncpa [#allocation9], 1 }
 0x3cc   :  { %1083 = vsyncpa [#allocation4], 1 }
 0x3cd   :  { %1085 = vsyncpa [#allocation4 + $0x1], 1 }

</bundles_post_ra>
